<compile_context>
chip_gen: v5e
topology: v5e:2x2
jax: 0.10.0
libtpu: 0.0.40
codegen_flags: <defaults>
</compile_context>

<pallas_src>
import functools

import jax
import jax.numpy as jnp
from jax.experimental import pallas as pl
from jax.experimental.pallas import tpu as pltpu

WORD_EMB = 300


def _round_up(n, m):
    return ((n + m - 1) // m) * m


# ---------------------------------------------------------------------------
# Kernel: one Dec_LSTM step per grid point, recurrent state in VMEM scratch.
# ---------------------------------------------------------------------------
def _dec_lstm_step_kernel(xps_ref, init_ref, w_i_ref, w_h_ref, out_ref,
                          c_scr, h_scr, *, hidden):
    t = pl.program_id(1)
    H = hidden
    bt = xps_ref.shape[0]

    # (Re)load the recurrent carry at the first step of each batch tile.
    @pl.when(t == 0)
    def _():
        c_scr[...] = init_ref[:, :H]
        h_scr[...] = init_ref[:, H:]

    # Fused MXU pass over [x | parent_h | sibling | 1(bias) | 0-pad] with the
    # VMEM-resident i2h weight (bias folded into a weight row), plus a small
    # K=H pass for prev_h read straight from the VMEM carry.
    gates = jnp.dot(xps_ref[...], w_i_ref[...],
                    preferred_element_type=jnp.float32)
    gates = gates + jnp.dot(h_scr[...].astype(jnp.bfloat16), w_h_ref[...],
                            preferred_element_type=jnp.float32)

    # Two full-vreg transcendental passes, then 32-lane slices.  All
    # post-matmul gate math stays f32 (v5e has no bf16 VPU/EUP).
    # Note: 4*H == 128 here so `gates` rows are exactly one vreg wide; other H
    # values stay correct but the slices become partial-lane ops.
    sig = jax.nn.sigmoid(gates)
    th = jnp.tanh(gates)
    ingate = sig[:, 0 * H:1 * H]
    forgetgate = sig[:, 1 * H:2 * H]
    cellgate = th[:, 2 * H:3 * H]
    outgate = sig[:, 3 * H:4 * H]

    cy = forgetgate * c_scr[...] + ingate * cellgate
    hy = outgate * jnp.tanh(cy)

    # Carry for the next step stays in VMEM.
    c_scr[...] = cy
    h_scr[...] = hy

    # Lane-dense packed output: [cy | hy | zero pad] -> unmasked full-lane vst.
    out_w = out_ref.shape[-1]
    pieces = [cy, hy]
    if out_w > 2 * H:
        pieces.append(jnp.zeros((bt, out_w - 2 * H), jnp.float32))
    out_ref[...] = jnp.concatenate(pieces, axis=1)


# ---------------------------------------------------------------------------
# One-time parameter preparation (fuse bias, pad K, bf16-cast)
# ---------------------------------------------------------------------------
def fuse_params(wi_t, bi, wh_t, bh):
    """Fold (bi + bh) into an extra i2h row, pad K to 128-multiple, cast bf16."""
    k1 = wi_t.shape[0] + 1                      # 300 + 2H real rows + bias row
    k1_pad = _round_up(k1, 128)
    w_i = jnp.concatenate([wi_t, (bi + bh).reshape(1, -1)], axis=0)
    w_i = jnp.pad(w_i, ((0, k1_pad - k1), (0, 0)))   # zero rows -> no-op in dot
    return w_i.astype(jnp.bfloat16), wh_t.astype(jnp.bfloat16)


def _prep_inputs(x_seq, parent_seq, sibling_seq, k1_pad):
    """Pack [x | parent_h | sibling | 1] once for the whole sequence (bf16)."""
    T, B, _ = x_seq.shape
    ones = jnp.ones((T, B, 1), x_seq.dtype)
    xps = jnp.concatenate([x_seq, parent_seq, sibling_seq, ones], axis=2)
    pad = k1_pad - xps.shape[2]
    if pad:
        xps = jnp.pad(xps, ((0, 0), (0, 0), (0, pad)))
    return xps.astype(jnp.bfloat16)


# ---------------------------------------------------------------------------
# Forward wrappers
# ---------------------------------------------------------------------------
@functools.partial(jax.jit, static_argnames=("batch_tile",))
def dec_lstm_decode(x_seq, parent_seq, sibling_seq, c0, h0, w_i, w_h,
                    batch_tile=None):
    """Run T recurrent Dec_LSTM steps in ONE persistent pallas_call.

    x_seq:(T,B,300)  parent_seq/sibling_seq:(T,B,H)  c0/h0:(B,H)  -> (cy,hy):(T,B,H)
    """
    T, B, _ = x_seq.shape
    H = c0.shape[1]
    k1_pad, G = w_i.shape
    assert G == 4 * H and w_h.shape == (H, G)
    assert k1_pad >= WORD_EMB + 2 * H + 1

    if batch_tile is None or B % batch_tile != 0:
        batch_tile = B                     # whole node batch = one tall MXU tile
    nb = B // batch_tile

    out_w = _round_up(2 * H, 128)          # lane-dense packed (cy | hy | pad)
    xps = _prep_inputs(x_seq, parent_seq, sibling_seq, k1_pad)   # once per decode
    init_ch = jnp.concatenate([c0, h0], axis=1)                  # (B, 2H) f32

    kernel = functools.partial(_dec_lstm_step_kernel, hidden=H)

    out = pl.pallas_call(
        kernel,
        out_shape=jax.ShapeDtypeStruct((T, B, out_w), jnp.float32),
        grid=(nb, T),
        in_specs=[
            # Per-step streamed input block.
            pl.BlockSpec((None, batch_tile, k1_pad), lambda b, t: (t, b, 0)),
            # Initial carry: block changes only with the batch tile.
            pl.BlockSpec((batch_tile, 2 * H), lambda b, t: (b, 0)),
            # Same block for every grid point -> weights DMA'd once, resident.
            pl.BlockSpec((k1_pad, G), lambda b, t: (0, 0)),
            pl.BlockSpec((H, G), lambda b, t: (0, 0)),
        ],
        out_specs=pl.BlockSpec((None, batch_tile, out_w), lambda b, t: (t, b, 0)),
        scratch_shapes=[
            pltpu.VMEM((batch_tile, H), jnp.float32),   # prev_c carry
            pltpu.VMEM((batch_tile, H), jnp.float32),   # prev_h carry
        ],
        compiler_params=pltpu.CompilerParams(
            # node/batch axis parallel (v7x 2 TCs); step axis is the recurrence.
            dimension_semantics=("parallel", "arbitrary")),
    )(xps, init_ch, w_i, w_h)

    return out[..., :H], out[..., H:2 * H]


def dec_lstm_forward(x, prev_c, prev_h, parent_h, sibling_state, w_i, w_h):
    """Single-cell forward matching Dec_LSTM.forward (eval mode)."""
    cy, hy = dec_lstm_decode(x[None], parent_h[None], sibling_state[None],
                             prev_c, prev_h, w_i, w_h)
    return cy[0], hy[0]


# ---------------------------------------------------------------------------
# Init + references
# ---------------------------------------------------------------------------
def init_params(key, rnn_size):
    """Deterministic init matching nn.Linear shapes (uniform +-1/sqrt(fan_in))."""
    D_in = WORD_EMB + 2 * rnn_size
    G = 4 * rnn_size
    k1, k2, k3, k4 = jax.random.split(key, 4)
    bound_i = 1.0 / jnp.sqrt(D_in)
    bound_h = 1.0 / jnp.sqrt(rnn_size)
    wi_t = jax.random.uniform(k1, (D_in, G), jnp.float32, -bound_i, bound_i)
    bi = jax.random.uniform(k2, (G,), jnp.float32, -bound_i, bound_i)
    wh_t = jax.random.uniform(k3, (rnn_size, G), jnp.float32, -bound_h, bound_h)
    bh = jax.random.uniform(k4, (G,), jnp.float32, -bound_h, bound_h)
    return wi_t, bi, wh_t, bh


def reference_step(x, prev_c, prev_h, parent_h, sibling_state, wi_t, bi, wh_t, bh):
    """Pure-JAX f32 reference mirroring the PyTorch forward exactly."""
    hp = jax.lax.Precision.HIGHEST
    input_cat = jnp.concatenate([x, parent_h, sibling_state], axis=1)
    gates = (jnp.dot(input_cat, wi_t, precision=hp) + bi
             + jnp.dot(prev_h, wh_t, precision=hp) + bh)
    i, f, g, o = jnp.split(gates, 4, axis=1)
    cy = jax.nn.sigmoid(f) * prev_c + jax.nn.sigmoid(i) * jnp.tanh(g)
    hy = jax.nn.sigmoid(o) * jnp.tanh(cy)
    return cy, hy


def reference_decode(x_seq, parent_seq, sibling_seq, c0, h0, wi_t, bi, wh_t, bh):
    def step(carry, inp):
        c, h = carry
        x, ph, sib = inp
        cy, hy = reference_step(x, c, h, ph, sib, wi_t, bi, wh_t, bh)
        return (cy, hy), (cy, hy)
    _, (cy_seq, hy_seq) = jax.lax.scan(
        step, (c0, h0), (x_seq, parent_seq, sibling_seq))
    return cy_seq, hy_seq


def reference_decode_quantized(x_seq, parent_seq, sibling_seq, c0, h0, w_i, w_h):
    """Pure-JAX reference using the SAME bf16 operands / folded bias as the kernel."""
    xps = _prep_inputs(x_seq, parent_seq, sibling_seq, w_i.shape[0])

    def step(carry, xps_t):
        c, h = carry
        gates = (jnp.dot(xps_t, w_i, preferred_element_type=jnp.float32)
                 + jnp.dot(h.astype(jnp.bfloat16), w_h,
                           preferred_element_type=jnp.float32))
        i, f, g, o = jnp.split(gates, 4, axis=1)
        cy = jax.nn.sigmoid(f) * c + jax.nn.sigmoid(i) * jnp.tanh(g)
        hy = jax.nn.sigmoid(o) * jnp.tanh(cy)
        return (cy, hy), (cy, hy)

    _, (cy_seq, hy_seq) = jax.lax.scan(step, (c0, h0), xps)
    return cy_seq, hy_seq


# ---------------------------------------------------------------------------
if __name__ == "__main__":
    B, H, T = 16, 32, 6     # small demo: 2 batch tiles of 8 nodes x 6 decode steps

    key = jax.random.PRNGKey(0)
    kp, kx, kc, kh, kph, ks = jax.random.split(key, 6)

    wi_t, bi, wh_t, bh = init_params(kp, H)
    w_i, w_h = fuse_params(wi_t, bi, wh_t, bh)   # done once, resident for decode

    x_seq = jax.random.normal(kx, (T, B, WORD_EMB), jnp.float32)
    parent_seq = jax.random.normal(kph, (T, B, H), jnp.float32)
    sibling_seq = jax.random.normal(ks, (T, B, H), jnp.float32)
    c0 = jax.random.normal(kc, (B, H), jnp.float32)
    h0 = jax.random.normal(kh, (B, H), jnp.float32)

    # Multi-step persistent-kernel decode (2 "parallel" batch tiles x 6 steps
    # in a single pallas_call with VMEM-resident weights and carried state).
    cy_seq, hy_seq = dec_lstm_decode(x_seq, parent_seq, sibling_seq, c0, h0,
                                     w_i, w_h, batch_tile=8)
    jax.block_until_ready((cy_seq, hy_seq))

    # Check 1: exact-operand reference (same bf16 quantization / folded bias).
    cy_q, hy_q = reference_decode_quantized(x_seq, parent_seq, sibling_seq,
                                            c0, h0, w_i, w_h)
    assert jnp.allclose(cy_seq, cy_q, atol=2e-3, rtol=2e-3)
    assert jnp.allclose(hy_seq, hy_q, atol=2e-3, rtol=2e-3)

    # Check 2: pure-f32 PyTorch-equivalent reference (loose tolerance covers
    # the intentional bf16 quantization, compounded over T recurrent steps).
    cy_f, hy_f = reference_decode(x_seq, parent_seq, sibling_seq, c0, h0,
                                  wi_t, bi, wh_t, bh)
    assert jnp.allclose(cy_seq, cy_f, atol=6e-2, rtol=6e-2)
    assert jnp.allclose(hy_seq, hy_f, atol=6e-2, rtol=6e-2)

    # Check 3: module-equivalent single-step API (Dec_LSTM.forward semantics).
    cy1, hy1 = dec_lstm_forward(x_seq[0], c0, h0, parent_seq[0], sibling_seq[0],
                                w_i, w_h)
    cy1_f, hy1_f = reference_step(x_seq[0], c0, h0, parent_seq[0],
                                  sibling_seq[0], wi_t, bi, wh_t, bh)
    assert jnp.allclose(cy1, cy1_f, atol=5e-2, rtol=5e-2)
    assert jnp.allclose(hy1, hy1_f, atol=5e-2, rtol=5e-2)

    print("KERNEL_OK")
</pallas_src>

<mosaic_0001>
module attributes {stable_mosaic.version = 11 : i64} {
  func.func @_dec_lstm_step_kernel(%arg0: i32, %arg1: i32, %arg2: memref<1x8x384xbf16, #tpu.memory_space<vmem>>, %arg3: memref<8x64xf32, #tpu.memory_space<vmem>>, %arg4: memref<384x128xbf16, #tpu.memory_space<vmem>>, %arg5: memref<32x128xbf16, #tpu.memory_space<vmem>>, %arg6: memref<1x8x128xf32, #tpu.memory_space<vmem>>, %arg7: memref<8x32xf32, #tpu.memory_space<vmem>>, %arg8: memref<8x32xf32, #tpu.memory_space<vmem>>) attributes {dimension_semantics = [#tpu.dimension_semantics<parallel>, #tpu.dimension_semantics<arbitrary>], iteration_bounds = array<i64: 2, 6>, scalar_prefetch = 0 : i64, scratch_operands = 2 : i64, tpu.core_type = #tpu.core_type<tc>, window_params = [{transform_indices = @transform_0, window_bounds = array<i64: 1, 8, 384>}, {transform_indices = @transform_1, window_bounds = array<i64: 8, 64>}, {pipeline_mode = #tpu.pipeline_mode<synchronous>, transform_indices = @transform_2, window_bounds = array<i64: 384, 128>}, {pipeline_mode = #tpu.pipeline_mode<synchronous>, transform_indices = @transform_3, window_bounds = array<i64: 32, 128>}, {transform_indices = @transform_4, window_bounds = array<i64: 1, 8, 128>}]} {
    %c0_i32 = arith.constant 0 : i32
    %0 = arith.cmpi eq, %arg1, %c0_i32 : i32
    %1 = arith.extui %0 : i1 to i32
    %c0_i32_0 = arith.constant 0 : i32
    %2 = arith.cmpi ne, %1, %c0_i32_0 : i32
    scf.if %2 {
      %c0_21 = arith.constant 0 : index
      %c0_22 = arith.constant 0 : index
      %35 = vector.load %arg3[%c0_21, %c0_22] : memref<8x64xf32, #tpu.memory_space<vmem>>, vector<8x32xf32>
      %c0_23 = arith.constant 0 : index
      %c0_24 = arith.constant 0 : index
      %36 = vector.load %arg7[%c0_23, %c0_24] : memref<8x32xf32, #tpu.memory_space<vmem>>, vector<8x32xf32>
      tpu.vector_store %arg7[%c0_23, %c0_24], %35 {strides = array<i32>} : memref<8x32xf32, #tpu.memory_space<vmem>>, vector<8x32xf32>,
      %c0_25 = arith.constant 0 : index
      %c32 = arith.constant 32 : index
      %37 = vector.load %arg3[%c0_25, %c32] : memref<8x64xf32, #tpu.memory_space<vmem>>, vector<8x32xf32>
      %c0_26 = arith.constant 0 : index
      %c0_27 = arith.constant 0 : index
      %38 = vector.load %arg8[%c0_26, %c0_27] : memref<8x32xf32, #tpu.memory_space<vmem>>, vector<8x32xf32>
      tpu.vector_store %arg8[%c0_26, %c0_27], %37 {strides = array<i32>} : memref<8x32xf32, #tpu.memory_space<vmem>>, vector<8x32xf32>,
    } else {
    }
    %c0 = arith.constant 0 : index
    %c0_1 = arith.constant 0 : index
    %c0_2 = arith.constant 0 : index
    %3 = vector.load %arg2[%c0, %c0_1, %c0_2] : memref<1x8x384xbf16, #tpu.memory_space<vmem>>, vector<1x8x384xbf16>
    %4 = vector.shape_cast %3 : vector<1x8x384xbf16> to vector<8x384xbf16>
    %c0_3 = arith.constant 0 : index
    %c0_4 = arith.constant 0 : index
    %5 = vector.load %arg4[%c0_3, %c0_4] : memref<384x128xbf16, #tpu.memory_space<vmem>>, vector<384x128xbf16>
    %cst = arith.constant dense<0.000000e+00> : vector<8x128xf32>
    %6 = tpu.matmul %4, %5, %cst {dimension_numbers = #tpu.dot_dimension_numbers<[1], [0], [0], [1], [0, 0, 1, 1], [], []>} : vector<8x384xbf16>, vector<384x128xbf16>, vector<8x128xf32> -> vector<8x128xf32>
    %c0_5 = arith.constant 0 : index
    %c0_6 = arith.constant 0 : index
    %7 = vector.load %arg8[%c0_5, %c0_6] : memref<8x32xf32, #tpu.memory_space<vmem>>, vector<8x32xf32>
    %8 = arith.truncf %7 : vector<8x32xf32> to vector<8x32xbf16>
    %c0_7 = arith.constant 0 : index
    %c0_8 = arith.constant 0 : index
    %9 = vector.load %arg5[%c0_7, %c0_8] : memref<32x128xbf16, #tpu.memory_space<vmem>>, vector<32x128xbf16>
    %cst_9 = arith.constant dense<0.000000e+00> : vector<8x128xf32>
    %10 = tpu.matmul %8, %9, %cst_9 {dimension_numbers = #tpu.dot_dimension_numbers<[1], [0], [0], [1], [0, 0, 1, 1], [], []>} : vector<8x32xbf16>, vector<32x128xbf16>, vector<8x128xf32> -> vector<8x128xf32>
    %11 = arith.addf %6, %10 : vector<8x128xf32>
    %12 = arith.negf %11 : vector<8x128xf32>
    %13 = math.exp %12 : vector<8x128xf32>
    %cst_10 = arith.constant 1.000000e+00 : f32
    %14 = vector.broadcast %cst_10 : f32 to vector<8x128xf32>
    %15 = arith.addf %14, %13 : vector<8x128xf32>
    %16 = arith.divf %14, %15 : vector<8x128xf32>
    %17 = math.tanh %11 : vector<8x128xf32>
    %18 = vector.extract_strided_slice %16 {offsets = [0, 0], sizes = [8, 32], strides = [1, 1]} : vector<8x128xf32> to vector<8x32xf32>
    %19 = vector.extract_strided_slice %16 {offsets = [0, 32], sizes = [8, 32], strides = [1, 1]} : vector<8x128xf32> to vector<8x32xf32>
    %20 = vector.extract_strided_slice %17 {offsets = [0, 64], sizes = [8, 32], strides = [1, 1]} : vector<8x128xf32> to vector<8x32xf32>
    %21 = vector.extract_strided_slice %16 {offsets = [0, 96], sizes = [8, 32], strides = [1, 1]} : vector<8x128xf32> to vector<8x32xf32>
    %c0_11 = arith.constant 0 : index
    %c0_12 = arith.constant 0 : index
    %22 = vector.load %arg7[%c0_11, %c0_12] : memref<8x32xf32, #tpu.memory_space<vmem>>, vector<8x32xf32>
    %23 = arith.mulf %19, %22 : vector<8x32xf32>
    %24 = arith.mulf %18, %20 : vector<8x32xf32>
    %25 = arith.addf %23, %24 : vector<8x32xf32>
    %26 = math.tanh %25 : vector<8x32xf32>
    %27 = arith.mulf %21, %26 : vector<8x32xf32>
    %c0_13 = arith.constant 0 : index
    %c0_14 = arith.constant 0 : index
    %28 = vector.load %arg7[%c0_13, %c0_14] : memref<8x32xf32, #tpu.memory_space<vmem>>, vector<8x32xf32>
    tpu.vector_store %arg7[%c0_13, %c0_14], %25 {strides = array<i32>} : memref<8x32xf32, #tpu.memory_space<vmem>>, vector<8x32xf32>,
    %c0_15 = arith.constant 0 : index
    %c0_16 = arith.constant 0 : index
    %29 = vector.load %arg8[%c0_15, %c0_16] : memref<8x32xf32, #tpu.memory_space<vmem>>, vector<8x32xf32>
    tpu.vector_store %arg8[%c0_15, %c0_16], %27 {strides = array<i32>} : memref<8x32xf32, #tpu.memory_space<vmem>>, vector<8x32xf32>,
    %cst_17 = arith.constant 0.000000e+00 : f32
    %30 = vector.broadcast %cst_17 : f32 to vector<8x64xf32>
    %31 = tpu.concatenate %25, %27, %30 in 1 : vector<8x32xf32>, vector<8x32xf32>, vector<8x64xf32> -> vector<8x128xf32>
    %c0_18 = arith.constant 0 : index
    %c0_19 = arith.constant 0 : index
    %c0_20 = arith.constant 0 : index
    %32 = vector.load %arg6[%c0_18, %c0_19, %c0_20] : memref<1x8x128xf32, #tpu.memory_space<vmem>>, vector<1x8x128xf32>
    %33 = vector.shape_cast %32 : vector<1x8x128xf32> to vector<8x128xf32>
    %34 = vector.shape_cast %31 : vector<8x128xf32> to vector<1x8x128xf32>
    tpu.vector_store %arg6[%c0_18, %c0_19, %c0_20], %34 {strides = array<i32>} : memref<1x8x128xf32, #tpu.memory_space<vmem>>, vector<1x8x128xf32>,
    return
  }
  func.func @transform_0(%arg0: i32, %arg1: i32) -> (i32, i32, i32) {
    %c0_i32 = arith.constant 0 : i32
    %c0_i32_0 = arith.constant 0 : i32
    return %arg1, %arg0, %c0_i32 : i32, i32, i32
  }
  func.func @transform_1(%arg0: i32, %arg1: i32) -> (i32, i32) {
    %c0_i32 = arith.constant 0 : i32
    %c0_i32_0 = arith.constant 0 : i32
    return %arg0, %c0_i32 : i32, i32
  }
  func.func @transform_2(%arg0: i32, %arg1: i32) -> (i32, i32) {
    %c0_i32 = arith.constant 0 : i32
    %c0_i32_0 = arith.constant 0 : i32
    %c0_i32_1 = arith.constant 0 : i32
    return %c0_i32, %c0_i32_0 : i32, i32
  }
  func.func @transform_3(%arg0: i32, %arg1: i32) -> (i32, i32) {
    %c0_i32 = arith.constant 0 : i32
    %c0_i32_0 = arith.constant 0 : i32
    %c0_i32_1 = arith.constant 0 : i32
    return %c0_i32, %c0_i32_0 : i32, i32
  }
  func.func @transform_4(%arg0: i32, %arg1: i32) -> (i32, i32, i32) {
    %c0_i32 = arith.constant 0 : i32
    %c0_i32_0 = arith.constant 0 : i32
    return %arg1, %arg0, %c0_i32 : i32, i32, i32
  }
}

</mosaic_0001>

<bundles_post_ra>
// kernel: dec_lstm_decode.1
= control target key start
LH: loop header
LB: loop body
LE: loop exit
PB: predicated region body
PF: predicated region fallthrough
CT: control target
= control target key end

     0   :  { %s969_s15 = smov 0   ;;  %s971_s16 = smov 0   ;;  %s1123_s0 = inlined_call_operand.vmem [shape: bf16[6,16,384], index: 0, kind: input, shape index: {}]   ;;  %s1124_s1 = inlined_call_operand.vmem [shape: f32[16,64], index: 1, kind: input, shape index: {}]   ;;  %s1125_s2 = inlined_call_operand.vmem [shape: bf16[384,128], index: 2, kind: input, shape index: {}]   ;;  %s1126_s3 = inlined_call_operand.vmem [shape: bf16[32,128], index: 3, kind: input, shape index: {}]   ;;  %s1127_s4 = inlined_call_operand.vmem [shape: f32[6,16,128], index: 4, kind: output, shape index: {}]  }
   0x1   :  { %s973_s17 = smov 0   ;;  %s975_s18 = smov 0  }
   0x2   :  { %s977_s19 = smov 0  }
   0x3 LB: > { %s23_s20 = sadd.s32 1, %s930_s17  ;;  %s26_s21 = sadd.s32 1, %s934_s18  ;;  %s938_s19 = sphi %s977_s19, %s14_s19   ;;  %s934_s18 = sphi %s975_s18, %s1131_s18   ;;  %s930_s17 = sphi %s973_s17, %s1130_s17   ;;  %s926_s16 = sphi %s971_s16, %s1129_s16   ;;  %s922_s15 = sphi %s969_s15, %s1128_s15  }
   0x4   : > { %p24_p0 = scmp.ge.s32.totalorder %s23_s20, 6  ;;  %p706_p1 = scmp.ge.s32.totalorder %s938_s19, 1 }
   0x5   : > { %p191_p2 = scmp.lt.s32.totalorder %s938_s19, 13 }
   0x6   : > { %s1133_s20 = smov (%p24_p0, %s23_s20), 0  ;;  %s1135_s21 = smov (!%p24_p0, %s26_s21), %s934_s18 }
   0x7   : > { %p192_p3 = pnand %p706_p1, %p191_p2  ;;  %p28_p4 = scmp.ge.s32.totalorder %s1135_s21, 2 }
   0x8   : > { %p228_p5 = scmp.lt.s32.totalorder (!%p192_p3), %s922_s15, 5  ;;  %p230_p6 = scmp.lt.s32.totalorder (!%p192_p3), %s926_s16, 1 }
   0x9   : > { %s1137_s21 = smov (%p28_p4, %s1135_s21), 0  ;;  %195 = sbr.rel (%p192_p3) target bundleno = 793 (0x319), region = 36 }
   0xa   : > { %p711_p7 = scmp.ne.s32.totalorder (!%p192_p3), %s922_s15, 0 }
   0xe   : > { %s229_s22 = scalar_select %p228_p5, %s922_s15, 5 }
   0xf   : > { %s1139_s16 = smov (!%p230_p6, %s926_s16), 1  ;;  %s940_s14 = smov (!%p711_p7), 96  }
  0x10   : > { %s847_s23 = smul.u32 6, %s229_s22  ;;  %s709_s24 = sshll.u32 %s229_s22, 1 }
  0x11   : > { %s846_s25 = smul.u32 3, %s1139_s16  ;;  %s708_s26 = sshll.u32 %s1139_s16, 3 }
  0x12   : > { %s240_s29 = scalar_lea.vmem %s1124_s1, %s708_s26  ;;  %s246_s30 = sadd.s32 %s709_s24, %s1139_s16 }
  0x13   : > { %s234_s5 = sadd.s32 %s847_s23, %s846_s25  ;;  %s710_s6 = sshll.u32 %s246_s30, 3 }
  0x14   : > { %s707_s7 = sshll.u32 %s234_s5, 2  ;;  %s1009_s10 = scalar_lea.vmem %s1127_s4, %s710_s6 }
  0x15   : > { %s1014_s13 = scalar_lea.vmem %s1123_s0, %s707_s7  ;;  %253 = sbr.rel (%p711_p7) target bundleno = 143 (0x8f), region = 40 }
  0x1a   : > { %v257_v0 = vld [vmem:[%s240_s29] sm:$0xff]  ;;  %vm255_vm0 = vcmask 261120  }
  0x1b   : > { %259 = vrot.lane.b32.xlu0 %v257_v0, %s940_s14  ;;  %256 = vst.msk [vmem:[#allocation2] sm:$0xff] %vm255_vm0, %v257_v0 }
  0x8d   : > { %v260_v1 = vpop.permute.xlu0 %259 }
  0x8e   : > { %262 = vst.msk [vmem:[#allocation3] sm:$0xff] %vm255_vm0, %v260_v1 }
  0x8f PF: > { %v827_v2 = vld [vmem:[%s1125_s2 + $0x38] sm:$0xff]  ;;  %v826_v5 = vld [vmem:[%s1125_s2 + $0x30] sm:$0xff]  ;;  %v845_v8 = vld [vmem:[%s1126_s3 + $0x8] sm:$0xff]  ;;  %vm331_vm1 = vcmask 261120   ;;  %s942_s8 = smov 32   ;;  %s943_s9 = smov 96  }
  0x90   : > { %v835_v3 = vld [vmem:[%s1125_s2 + $0x78] sm:$0xff]  ;;  %503 = vmatpush.bf16.msra.mxu1 %v827_v2  ;;  %v834_v6 = vld [vmem:[%s1125_s2 + $0x70] sm:$0xff]  ;;  %v825_v9 = vld [vmem:[%s1125_s2 + $0x28] sm:$0xff]  ;;  %341 = vmatpush.bf16.msra.mxu0 %v845_v8  ;;  %vm598_vm6 = vcmask 523264  }
  0x91   : > { %v843_v4 = vld [vmem:[%s1125_s2 + $0xb8] sm:$0xff]  ;;  %516 = vmatpush.bf16.msra.mxu2 %v835_v3  ;;  %v842_v7 = vld [vmem:[%s1125_s2 + $0xb0] sm:$0xff]  ;;  %v833_v10 = vld [vmem:[%s1125_s2 + $0x68] sm:$0xff] }
  0x92   : > { %529 = vmatpush.bf16.msra.mxu3 %v843_v4  ;;  %v841_v11 = vld [vmem:[%s1125_s2 + $0xa8] sm:$0xff]  ;;  %v844_v12 = vld [vmem:[%s1126_s3] sm:$0xff]  ;;  %v823_v18 = vld [vmem:[%s1125_s2 + $0x18] sm:$0xff] }
  0x93   : > { %v824_v14 = vld [vmem:[%s1125_s2 + $0x20] sm:$0xff]  ;;  %v831_v19 = vld [vmem:[%s1125_s2 + $0x58] sm:$0xff]  ;;  %v822_v21 = vld [vmem:[%s1125_s2 + $0x10] sm:$0xff] }
  0x94   : > { %504 = vmatpush.bf16.msra.mxu1 %v826_v5  ;;  %v832_v15 = vld [vmem:[%s1125_s2 + $0x60] sm:$0xff]  ;;  %342 = vmatpush.bf16.msra.mxu0 %v844_v12  ;;  %v839_v20 = vld [vmem:[%s1125_s2 + $0x98] sm:$0xff]  ;;  %v830_v22 = vld [vmem:[%s1125_s2 + $0x50] sm:$0xff] }
  0x95   : > { %517 = vmatpush.bf16.msra.mxu2 %v834_v6  ;;  %v313_v13 = vld [vmem:[#allocation3] sm:$0xff]  ;;  %v840_v16 = vld [vmem:[%s1125_s2 + $0xa0] sm:$0xff]  ;;  %v838_v23 = vld [vmem:[%s1125_s2 + $0x90] sm:$0xff] }
  0x96   : > { %530 = vmatpush.bf16.msra.mxu3 %v842_v7  ;;  %v314_v17 = vpack.c.bf16 %v313_v13, %v313_v13  ;;  %v821_v24 = vld [vmem:[%s1125_s2 + $0x8] sm:$0xff]  ;;  %v263_v26 = vld [vmem:[%s1014_s13] sm:$0xff] }
  0x97   : > { %v829_v25 = vld [vmem:[%s1125_s2 + $0x48] sm:$0xff]  ;;  %v350_v29 = vunpack.c.l.b16 %v263_v26  ;;  %v351_v30 = vunpack.c.h.b16 %v263_v26  ;;  %v820_v31 = vld [vmem:[%s1125_s2] sm:$0xff] }
  0x98   : > { %505 = vmatpush.bf16.msra.mxu1 %v825_v9  ;;  %720 = vmatmul.msk.bf16.vlgmr.msra.gmra.mxu0 %vm331_vm1, %v314_v17  ;;  %v837_v27 = vld [vmem:[%s1125_s2 + $0x88] sm:$0xff]  ;;  %v828_v32 = vld [vmem:[%s1125_s2 + $0x40] sm:$0xff] }
  0x99   : > { %518 = vmatpush.bf16.msra.mxu2 %v833_v10  ;;  %v264_v28 = vld [vmem:[%s1014_s13 + $0x8] sm:$0xf]  ;;  %v836_v34 = vld [vmem:[%s1125_s2 + $0x80] sm:$0xff]  ;;  %v353_v35 = vpack.c.b16 %v350_v29, %v350_v29  ;;  %v354_v36 = vpack.c.b16 %v351_v30, %v351_v30  ;;  %s941_s13 = smov 64  }
  0x9a   : > { %531 = vmatpush.bf16.msra.mxu3 %v841_v11  ;;  %v352_v33 = vunpack.c.l.b16 %v264_v28  ;;  %v562_v50 = vld [vmem:[#allocation2] sm:$0xff] }
  0x9c   : > { %506 = vmatpush.bf16.msra.mxu1 %v824_v14  ;;  %v355_v37 = vpack.c.b16 %v352_v33, %v352_v33 }
  0x9d   : > { %519 = vmatpush.bf16.msra.mxu2 %v832_v15 }
  0x9e   : > { %532 = vmatpush.bf16.msra.mxu3 %v840_v16 }
  0xa0   : > { %507 = vmatpush.bf16.msra.mxu1 %v823_v18 }
  0xa1   : > { %520 = vmatpush.bf16.msra.mxu2 %v831_v19 }
  0xa2   : > { %533 = vmatpush.bf16.msra.mxu3 %v839_v20 }
  0xa4   : > { %508 = vmatpush.bf16.msra.mxu1 %v822_v21 }
  0xa5   : > { %521 = vmatpush.bf16.msra.mxu2 %v830_v22 }
  0xa6   : > { %534 = vmatpush.bf16.msra.mxu3 %v838_v23 }
  0xa8   : > { %509 = vmatpush.bf16.msra.mxu1 %v821_v24 }
  0xa9   : > { %522 = vmatpush.bf16.msra.mxu2 %v829_v25 }
  0xaa   : > { %535 = vmatpush.bf16.msra.mxu3 %v837_v27 }
  0xac   : > { %510 = vmatpush.bf16.msra.mxu1 %v820_v31 }
  0xad   : > { %523 = vmatpush.bf16.msra.mxu2 %v828_v32 }
  0xae   : > { %536 = vmatpush.bf16.msra.mxu3 %v836_v34 }
  0xaf   : > { %511 = vmatmul.bf16.vlgmr.msra.gmra.mxu1 %v353_v35 }
  0xb0   : > { %524 = vmatmul.bf16.vlgmr.msra.gmra.mxu2 %v354_v36 }
  0xb1   : > { %537 = vmatmul.bf16.vlgmr.msra.gmra.mxu3 %v355_v37 }
 0x115   : > { %v344_v38 = vpop.f32.mrf.mxu0 }
 0x11d   : > { %v346_v39 = vpop.f32.mrf.mxu0 }
 0x12c   : > { %v512_v40 = vpop.f32.mrf.mxu1 }
 0x12d   : > { %v513_v41 = vadd.f32 %v512_v40, %v344_v38 }
 0x133   : > { %v525_v42 = vpop.f32.mrf.mxu2 }
 0x134   : > { %v526_v43 = vadd.f32 %v525_v42, %v513_v41  ;;  %v538_v44 = vpop.f32.mrf.mxu3  ;;  %v514_v45 = vpop.f32.mrf.mxu1 }
 0x136   : > { %v539_v46 = vadd.f32 %v538_v44, %v526_v43 }
 0x138   : > { %892 = vtanh.f32 %v539_v46  ;;  %v817_v51 = vmul.f32 -1.442695, %v539_v46 }
 0x13a   : > { %894 = vpow2.f32 %v817_v51 }
 0x13b   : > { %v527_v47 = vpop.f32.mrf.mxu2 }
 0x13c   : > { %v540_v48 = vpop.f32.mrf.mxu3 }
 0x13e   : > { %v893_v49 = vpop.eup %892 }
 0x13f   : > { %569 = vrot.lane.b32.xlu0 %v893_v49, %s941_s13 }
 0x140   : > { %v895_v52 = vpop.eup %894 }
 0x141   : > { %v545_v53 = vadd.f32 1.0, %v895_v52 }
 0x143   : > { %896 = vrcp.f32 %v545_v53  ;;  %v557_v59 = vand.u32 2147483648, %v545_v53  ;;  %vm551_vm3 = vweird.f32 %v545_v53  ;;  %v555_v60 = vand.u32 2147483647, %v545_v53 }
 0x145   : > { %v558_v62 = vor.u32 1.1754944e-38, %v557_v59  ;;  %vm556_vm5 = vcmp.eq.f32.partialorder %v555_v60, 8.507059e+37 }
 0x147   : > { %564 = vrot.lane.b32.xlu0 %v562_v50, %s942_s8 }
 0x149   : > { %v897_v54 = vpop.eup %896 }
 0x14a   : > { %v547_v55 = vmul.f32 %v897_v54, %v545_v53  ;;  %vm552_vm2 = vweird.f32 %v897_v54 }
 0x14b   : > { %vm553_vm4 = vmor %vm551_vm3, %vm552_vm2 }
 0x14c   : > { %v548_v56 = vsub.f32 1.0, %v547_v55 }
 0x14e   : > { %v549_v57 = vmul.f32 %v897_v54, %v548_v56 }
 0x150   : > { %v550_v58 = vadd.f32 %v897_v54, %v549_v57 }
 0x152   : > { %v554_v61 = vsel %vm553_vm4, %v897_v54, %v550_v58 }
 0x153   : > { %v559_v0 = vsel %vm556_vm5, %v558_v62, %v554_v61 }
 0x1b1   : > { %v570_v63 = vpop.permute.xlu0 %569 }
 0x1b2   : > { %v572_v1 = vmul.f32 %v570_v63, %v559_v0 }
 0x1b4   : > { %574 = vrot.lane.b32.xlu1 %v572_v1, %s942_s8 }
 0x1b9   : > { %v565_v2 = vpop.permute.xlu0 %564 }
 0x1ba   : > { %v567_v3 = vmul.f32 %v565_v2, %v559_v0 }
 0x226   : > { %v575_v4 = vpop.permute.xlu1 %574 }
 0x227   : > { %v577_v5 = vadd.f32 %v575_v4, %v567_v3 }
 0x229   : > { %898 = vtanh.f32 %v577_v5  ;;  %585 = vrot.lane.b32.xlu2 %v577_v5, %s943_s9 }
 0x22f   : > { %v899_v6 = vpop.eup %898 }
 0x230   : > { %580 = vrot.lane.b32.xlu1 %v899_v6, %s941_s13 }
 0x283   : > { %v586_v7 = vpop.permute.xlu2 %585 }
 0x284   : > { %588 = vst.msk [vmem:[#allocation2] sm:$0xff] %vm331_vm1, %v586_v7 }
 0x2a2   : > { %v581_v8 = vpop.permute.xlu1 %580 }
 0x2a3   : > { %v583_v9 = vmul.f32 %v581_v8, %v559_v0 }
 0x2a5   : > { %590 = vrot.lane.b32.xlu0 %v583_v9, %s942_s8  ;;  %594 = vrot.lane.b32.xlu2 %v583_v9, %s941_s13 }
 0x2ff   : > { %v595_v10 = vpop.permute.xlu2 %594 }
 0x300   : > { %v597_v11 = vsel %vm331_vm1, %v586_v7, %v595_v10 }
 0x301   : > { %v599_v12 = vsel %vm598_vm6, %v597_v11, 0.0 }
 0x302   : > { %600 = vst [vmem:[%s1009_s10] sm:$0xff] %v599_v12 }
 0x317   : > { %v591_v13 = vpop.permute.xlu0 %590 }
 0x318   : > { %593 = vst.msk [vmem:[#allocation3] sm:$0xff] %vm331_vm1, %v591_v13 }
 0x319 PF: > { %s14_s19 = sadd.s32 1, %s938_s19   ;;  %s1128_s15 = smov %s930_s17 }
 0x31a   : > { %p11_p8 = scmp.ge.s32.totalorder %s14_s19, 14   ;;  %s1129_s16 = smov %s934_s18 }
 0x31b   : > { %s1130_s17 = smov %s1133_s20  ;;  %s1131_s18 = smov %s1137_s21 }
 0x31c   :  { %13 = sbr.rel (!%p11_p8) target bundleno = 3 (0x3), region = 73 }

</bundles_post_ra>
